<compile_context>
chip_gen: v5e
topology: v5e:2x2
jax: 0.10.0
libtpu: 0.0.40
codegen_flags: <defaults>
</compile_context>

<pallas_src>
import functools

import numpy as np
import jax
import jax.numpy as jnp
from jax.experimental import pallas as pl
from jax.experimental.pallas import tpu as pltpu


# Hamilton-product sign table: W[row-block p, col-block q] = _SIGN[p][q] * quarter[p ^ q]
# (quarter index 0=r, 1=i, 2=j, 3=k), matching torch's cat_kernels_4_quaternion assembly.
_SIGN = ((+1, +1, +1, +1),
         (-1, +1, +1, -1),
         (-1, -1, +1, +1),
         (-1, +1, -1, +1))


# ----------------------------------------------------------------------------
# Deterministic re-implementation of quaternion_init (no scipy / torch needed).
# chi(4) samples are drawn as sqrt(sum of 4 squared standard normals).
# ----------------------------------------------------------------------------
def quaternion_init_np(in_features, out_features, seed=0, criterion="glorot"):
    rng = np.random.RandomState(seed)
    fan_in, fan_out = in_features, out_features
    if criterion == "glorot":
        s = 1.0 / np.sqrt(2 * (fan_in + fan_out))
    elif criterion == "he":
        s = 1.0 / np.sqrt(2 * fan_in)
    else:
        raise ValueError("Invalid criterion: " + criterion)

    kernel_shape = (in_features, out_features)
    n = int(np.prod(kernel_shape))

    normals = rng.normal(0.0, 1.0, size=(n, 4))
    modulus = (s * np.sqrt((normals ** 2).sum(axis=1))).reshape(kernel_shape)

    v_i = rng.normal(0.0, 1.0, n)
    v_j = rng.normal(0.0, 1.0, n)
    v_k = rng.normal(0.0, 1.0, n)
    norm = np.sqrt(v_i ** 2 + v_j ** 2 + v_k ** 2 + 0.0001)
    v_i = (v_i / norm).reshape(kernel_shape)
    v_j = (v_j / norm).reshape(kernel_shape)
    v_k = (v_k / norm).reshape(kernel_shape)

    phase = rng.uniform(low=-np.pi, high=np.pi, size=kernel_shape)

    weight_r = modulus * np.cos(phase)
    weight_i = modulus * v_i * np.sin(phase)
    weight_j = modulus * v_j * np.sin(phase)
    weight_k = modulus * v_k * np.sin(phase)
    return weight_r, weight_i, weight_j, weight_k


def assemble_full_weight(r, i, j, k):
    """Pure-JAX reference assembly of the (IN, OUT) Hamilton matrix (for checks only)."""
    cat_r = jnp.concatenate([r, -i, -j, -k], axis=0)
    cat_i = jnp.concatenate([i, r, -k, j], axis=0)
    cat_j = jnp.concatenate([j, k, r, -i], axis=0)
    cat_k = jnp.concatenate([k, -j, i, r], axis=0)
    return jnp.concatenate([cat_r, cat_i, cat_j, cat_k], axis=1)


# ----------------------------------------------------------------------------
# Kernel.
#   x_ref : (tm, 4, tk)    one M tile of x, all four quaternion components
#   w_ref : (4, tk, tn)    one K x N tile of all four quarter weights
#   b_ref : (1, 4, tn)     bias slice for this N tile
#   o_ref : (tm, 4, tn)    output tile (all four output components)
#   scratch (only when the K grid has >1 step): (4, tm, tn) f32 accumulator
# ----------------------------------------------------------------------------
def _qlinear_kernel(x_ref, w_ref, b_ref, o_ref, *scratch, multi_k):
    xb = x_ref[...]                                   # (tm, 4, tk)
    w_tiles = [w_ref[m] for m in range(4)]            # four (tk, tn) quarter tiles

    # 16 MXU matmuls with compile-time +/-1 signs; p==0 row of the sign table is all +1,
    # so the accumulators are initialized directly (no zero-fill, no sign multiplies).
    accs = [None, None, None, None]
    for p in range(4):
        x_p = xb[:, p, :]                             # (tm, tk)
        for q in range(4):
            c = jnp.dot(x_p, w_tiles[p ^ q], preferred_element_type=jnp.float32)
            if accs[q] is None:
                accs[q] = c
            elif _SIGN[p][q] > 0:
                accs[q] = accs[q] + c
            else:
                accs[q] = accs[q] - c

    def _store_output(vals):
        bb = b_ref[...]                               # (1, 4, tn)
        for q in range(4):
            o_ref[:, q, :] = (vals[q] + bb[:, q, :]).astype(o_ref.dtype)

    if not multi_k:
        # Full-K fast path: one grid step per output tile, no scratch round-trip.
        _store_output(accs)
    else:
        acc_ref = scratch[0]                          # (4, tm, tn) f32
        k = pl.program_id(2)

        @pl.when(k == 0)
        def _():
            for q in range(4):
                acc_ref[q] = accs[q]

        @pl.when(k > 0)
        def _():
            for q in range(4):
                acc_ref[q] += accs[q]

        @pl.when(k == pl.num_programs(2) - 1)
        def _():
            _store_output([acc_ref[q] for q in range(4)])


# ----------------------------------------------------------------------------
# Tiling / padding helpers.
# ----------------------------------------------------------------------------
def _round_up(x, m):
    return ((x + m - 1) // m) * m


def _pick_tile_128(dim, cap):
    """Largest multiple of 128 that divides `dim` (dim % 128 == 0) and is <= cap."""
    best = 128
    t = 128
    while t <= min(dim, cap):
        if dim % t == 0:
            best = t
        t += 128
    return best


def _plan_dim(size, cap):
    """Return (padded_size, tile) for a quarter (lane) dimension."""
    if size % 128 == 0:
        return size, _pick_tile_128(size, cap)
    if size <= cap:
        return size, size            # single full-extent tile (allowed by Mosaic)
    padded = _round_up(size, 128)    # zero-pad large unaligned dims to a 128 multiple
    return padded, _pick_tile_128(padded, cap)


def _device_budget():
    """Derive tile caps / scoped VMEM limit from the actual chip generation."""
    vmem_bytes = None
    try:
        vmem_bytes = int(pltpu.get_tpu_info().vmem_capacity_bytes)
    except Exception:
        vmem_bytes = None
    if vmem_bytes is not None and vmem_bytes >= 100 * 1024 * 1024:
        # v5e / v6e: 128 MiB physical VMEM -> larger tiles amortize per-step overhead.
        return {"tm_cap": 256, "tk_cap": 1024, "tn_cap": 1024,
                "vmem_limit": 96 * 1024 * 1024}
    # v7x (64 MiB physical) or unknown chip: stay conservative.
    return {"tm_cap": 256, "tk_cap": 512, "tn_cap": 512,
            "vmem_limit": 48 * 1024 * 1024}


# ----------------------------------------------------------------------------
# Forward wrapper: out = x @ W(r,i,j,k) + bias, x may have arbitrary leading dims.
# ----------------------------------------------------------------------------
def quaternion_linear_forward(x, w4, bias, *, tm_cap=None, tk_cap=None, tn_cap=None):
    orig_shape = x.shape
    IN = orig_shape[-1]
    four, in_q, out_q = w4.shape
    assert four == 4 and IN == 4 * in_q
    OUT = 4 * out_q

    budget = _device_budget()
    tm_cap = tm_cap or budget["tm_cap"]
    tk_cap = tk_cap or budget["tk_cap"]
    tn_cap = tn_cap or budget["tn_cap"]

    x2 = x.reshape(-1, IN)
    B = x2.shape[0]

    in_q_p, tk = _plan_dim(in_q, tk_cap)
    out_q_p, tn = _plan_dim(out_q, tn_cap)

    m_tiles = max(1, -(-B // tm_cap))                 # cdiv
    tm = _round_up(-(-B // m_tiles), 8)
    B_pad = tm * m_tiles

    k_tiles = in_q_p // tk
    n_tiles = out_q_p // tn

    # Keep a parallel grid axis with extent >= 2 when possible (v7x has 2 TensorCores).
    if m_tiles * n_tiles == 1 and tn % 256 == 0:
        tn //= 2
        n_tiles = 2

    # Zero-pad weights / bias / activations; padded rows and columns contribute nothing.
    w4p = w4
    if (in_q_p, out_q_p) != (in_q, out_q):
        w4p = jnp.pad(w4, ((0, 0), (0, in_q_p - in_q), (0, out_q_p - out_q)))
    bias3 = bias.reshape(1, 4, out_q)
    if out_q_p != out_q:
        bias3 = jnp.pad(bias3, ((0, 0), (0, 0), (0, out_q_p - out_q)))
    x3 = x2.reshape(B, 4, in_q)
    if (B_pad, in_q_p) != (B, in_q):
        x3 = jnp.pad(x3, ((0, B_pad - B), (0, 0), (0, in_q_p - in_q)))

    multi_k = k_tiles > 1
    scratch = [pltpu.VMEM((4, tm, tn), jnp.float32)] if multi_k else []

    grid = (m_tiles, n_tiles, k_tiles)
    cost = pl.CostEstimate(
        flops=2 * B_pad * (4 * in_q_p) * (4 * out_q_p),
        transcendentals=0,
        bytes_accessed=4 * (B_pad * 4 * in_q_p * n_tiles       # x re-read per N tile
                            + 4 * in_q_p * out_q_p * m_tiles   # quarters re-read per M tile
                            + B_pad * 4 * out_q_p              # output write
                            + 4 * out_q_p * m_tiles * n_tiles  # bias
                            ),
    )

    out3 = pl.pallas_call(
        functools.partial(_qlinear_kernel, multi_k=multi_k),
        out_shape=jax.ShapeDtypeStruct((B_pad, 4, out_q_p), x.dtype),
        grid_spec=pltpu.PrefetchScalarGridSpec(
            num_scalar_prefetch=0,
            grid=grid,
            in_specs=[
                pl.BlockSpec((tm, 4, tk), lambda i, j, k: (i, 0, k)),
                pl.BlockSpec((4, tk, tn), lambda i, j, k: (0, k, j)),
                pl.BlockSpec((1, 4, tn), lambda i, j, k: (0, 0, j)),
            ],
            out_specs=pl.BlockSpec((tm, 4, tn), lambda i, j, k: (i, 0, j)),
            scratch_shapes=scratch,
        ),
        compiler_params=pltpu.CompilerParams(
            dimension_semantics=("parallel", "parallel", "arbitrary"),
            vmem_limit_bytes=budget["vmem_limit"],
        ),
        cost_estimate=cost,
    )(x3, w4p, bias3)

    out = out3[:B, :, :out_q].reshape(B, OUT)
    return out.reshape(orig_shape[:-1] + (OUT,))


# ----------------------------------------------------------------------------
# Module-equivalent wrapper.
# ----------------------------------------------------------------------------
class QuaternionLinearAutogradPallas:
    def __init__(self, in_features, out_features, bias=True, init_criterion="glorot",
                 seed=0):
        assert in_features % 4 == 0 and out_features % 4 == 0
        self.in_features = in_features
        self.out_features = out_features
        self.in_q = in_features // 4
        self.out_q = out_features // 4

        r, i, j, k = quaternion_init_np(self.in_q, self.out_q, seed=seed,
                                        criterion=init_criterion)
        self.r_weight = jnp.asarray(r, dtype=jnp.float32)
        self.i_weight = jnp.asarray(i, dtype=jnp.float32)
        self.j_weight = jnp.asarray(j, dtype=jnp.float32)
        self.k_weight = jnp.asarray(k, dtype=jnp.float32)
        # Kernel operand: stacked quarters (4, in_q, out_q); the dense W never exists in HBM.
        self.w4 = jnp.stack([self.r_weight, self.i_weight,
                             self.j_weight, self.k_weight], axis=0)
        # bias is zero-filled by reset_parameters() in the torch module.
        self.bias = jnp.zeros((self.out_q * 4,), dtype=jnp.float32)

    def __call__(self, x, **tile_overrides):
        return quaternion_linear_forward(x, self.w4, self.bias, **tile_overrides)


if __name__ == "__main__":
    key = jax.random.PRNGKey(0)
    k1, k2, k3 = jax.random.split(key, 3)

    # 1) aligned path: batch=8, in=512, out=512 (quarters 128x128, single grid step).
    layer_a = QuaternionLinearAutogradPallas(512, 512, seed=0)
    x_a = jax.random.normal(k1, (8, 512), dtype=jnp.float32)
    out_a = jax.block_until_ready(layer_a(x_a))
    W_a = assemble_full_weight(layer_a.r_weight, layer_a.i_weight,
                               layer_a.j_weight, layer_a.k_weight)
    ref_a = (np.asarray(x_a, np.float64) @ np.asarray(W_a, np.float64)
             + np.asarray(layer_a.bias, np.float64))
    np.testing.assert_allclose(np.asarray(out_a), ref_a, rtol=1e-4, atol=1e-4)

    # 2) tiny unaligned quarters (8x8) + N-D input (exercises full-extent tiles & flattening).
    layer_b = QuaternionLinearAutogradPallas(32, 32, seed=1)
    x_b = jax.random.normal(k2, (2, 4, 32), dtype=jnp.float32)
    out_b = jax.block_until_ready(layer_b(x_b))
    W_b = assemble_full_weight(layer_b.r_weight, layer_b.i_weight,
                               layer_b.j_weight, layer_b.k_weight)
    ref_b = (np.asarray(x_b, np.float64).reshape(-1, 32) @ np.asarray(W_b, np.float64)
             + np.asarray(layer_b.bias, np.float64)).reshape(2, 4, 32)
    np.testing.assert_allclose(np.asarray(out_b), ref_b, rtol=1e-4, atol=1e-4)

    # 3) multi-K-tile accumulation path (tk_cap forced to 128 -> 2 K grid steps).
    layer_c = QuaternionLinearAutogradPallas(1024, 512, seed=2)
    x_c = jax.random.normal(k3, (16, 1024), dtype=jnp.float32)
    out_c = jax.block_until_ready(layer_c(x_c, tk_cap=128))
    W_c = assemble_full_weight(layer_c.r_weight, layer_c.i_weight,
                               layer_c.j_weight, layer_c.k_weight)
    ref_c = (np.asarray(x_c, np.float64) @ np.asarray(W_c, np.float64)
             + np.asarray(layer_c.bias, np.float64))
    np.testing.assert_allclose(np.asarray(out_c), ref_c, rtol=1e-4, atol=1e-4)

    print("KERNEL_OK")
</pallas_src>

<mosaic_0001>
module attributes {stable_mosaic.version = 11 : i64} {
  func.func @_qlinear_kernel(%arg0: i32, %arg1: i32, %arg2: i32, %arg3: memref<8x4x128xf32, #tpu.memory_space<vmem>>, %arg4: memref<4x128x128xf32, #tpu.memory_space<vmem>>, %arg5: memref<1x4x128xf32, #tpu.memory_space<vmem>>, %arg6: memref<8x4x128xf32, #tpu.memory_space<vmem>>) attributes {dimension_semantics = [#tpu.dimension_semantics<parallel>, #tpu.dimension_semantics<parallel>, #tpu.dimension_semantics<arbitrary>], iteration_bounds = array<i64: 1, 1, 1>, scalar_prefetch = 0 : i64, scratch_operands = 0 : i64, tpu.core_type = #tpu.core_type<tc>, window_params = [{transform_indices = @transform_0, window_bounds = array<i64: 8, 4, 128>}, {transform_indices = @transform_1, window_bounds = array<i64: 4, 128, 128>}, {transform_indices = @transform_2, window_bounds = array<i64: 1, 4, 128>}, {transform_indices = @transform_3, window_bounds = array<i64: 8, 4, 128>}]} {
    %c0 = arith.constant 0 : index
    %c0_0 = arith.constant 0 : index
    %c0_1 = arith.constant 0 : index
    %0 = vector.load %arg3[%c0, %c0_0, %c0_1] : memref<8x4x128xf32, #tpu.memory_space<vmem>>, vector<8x4x128xf32>
    %c0_2 = arith.constant 0 : index
    %c0_3 = arith.constant 0 : index
    %c0_4 = arith.constant 0 : index
    %1 = vector.load %arg4[%c0_2, %c0_3, %c0_4] : memref<4x128x128xf32, #tpu.memory_space<vmem>>, vector<1x128x128xf32>
    %2 = vector.shape_cast %1 : vector<1x128x128xf32> to vector<128x128xf32>
    %c1 = arith.constant 1 : index
    %c0_5 = arith.constant 0 : index
    %c0_6 = arith.constant 0 : index
    %3 = vector.load %arg4[%c1, %c0_5, %c0_6] : memref<4x128x128xf32, #tpu.memory_space<vmem>>, vector<1x128x128xf32>
    %4 = vector.shape_cast %3 : vector<1x128x128xf32> to vector<128x128xf32>
    %c2 = arith.constant 2 : index
    %c0_7 = arith.constant 0 : index
    %c0_8 = arith.constant 0 : index
    %5 = vector.load %arg4[%c2, %c0_7, %c0_8] : memref<4x128x128xf32, #tpu.memory_space<vmem>>, vector<1x128x128xf32>
    %6 = vector.shape_cast %5 : vector<1x128x128xf32> to vector<128x128xf32>
    %c3 = arith.constant 3 : index
    %c0_9 = arith.constant 0 : index
    %c0_10 = arith.constant 0 : index
    %7 = vector.load %arg4[%c3, %c0_9, %c0_10] : memref<4x128x128xf32, #tpu.memory_space<vmem>>, vector<1x128x128xf32>
    %8 = vector.shape_cast %7 : vector<1x128x128xf32> to vector<128x128xf32>
    %9 = vector.extract_strided_slice %0 {offsets = [0, 0, 0], sizes = [8, 1, 128], strides = [1, 1, 1]} : vector<8x4x128xf32> to vector<8x1x128xf32>
    %10 = vector.shape_cast %9 : vector<8x1x128xf32> to vector<8x128xf32>
    %cst = arith.constant dense<0.000000e+00> : vector<8x128xf32>
    %11 = tpu.matmul %10, %2, %cst {dimension_numbers = #tpu.dot_dimension_numbers<[1], [0], [0], [1], [0, 0, 1, 1], [], []>} : vector<8x128xf32>, vector<128x128xf32>, vector<8x128xf32> -> vector<8x128xf32>
    %cst_11 = arith.constant dense<0.000000e+00> : vector<8x128xf32>
    %12 = tpu.matmul %10, %4, %cst_11 {dimension_numbers = #tpu.dot_dimension_numbers<[1], [0], [0], [1], [0, 0, 1, 1], [], []>} : vector<8x128xf32>, vector<128x128xf32>, vector<8x128xf32> -> vector<8x128xf32>
    %cst_12 = arith.constant dense<0.000000e+00> : vector<8x128xf32>
    %13 = tpu.matmul %10, %6, %cst_12 {dimension_numbers = #tpu.dot_dimension_numbers<[1], [0], [0], [1], [0, 0, 1, 1], [], []>} : vector<8x128xf32>, vector<128x128xf32>, vector<8x128xf32> -> vector<8x128xf32>
    %cst_13 = arith.constant dense<0.000000e+00> : vector<8x128xf32>
    %14 = tpu.matmul %10, %8, %cst_13 {dimension_numbers = #tpu.dot_dimension_numbers<[1], [0], [0], [1], [0, 0, 1, 1], [], []>} : vector<8x128xf32>, vector<128x128xf32>, vector<8x128xf32> -> vector<8x128xf32>
    %15 = vector.extract_strided_slice %0 {offsets = [0, 1, 0], sizes = [8, 1, 128], strides = [1, 1, 1]} : vector<8x4x128xf32> to vector<8x1x128xf32>
    %16 = vector.shape_cast %15 : vector<8x1x128xf32> to vector<8x128xf32>
    %cst_14 = arith.constant dense<0.000000e+00> : vector<8x128xf32>
    %17 = tpu.matmul %16, %4, %cst_14 {dimension_numbers = #tpu.dot_dimension_numbers<[1], [0], [0], [1], [0, 0, 1, 1], [], []>} : vector<8x128xf32>, vector<128x128xf32>, vector<8x128xf32> -> vector<8x128xf32>
    %18 = arith.subf %11, %17 : vector<8x128xf32>
    %cst_15 = arith.constant dense<0.000000e+00> : vector<8x128xf32>
    %19 = tpu.matmul %16, %2, %cst_15 {dimension_numbers = #tpu.dot_dimension_numbers<[1], [0], [0], [1], [0, 0, 1, 1], [], []>} : vector<8x128xf32>, vector<128x128xf32>, vector<8x128xf32> -> vector<8x128xf32>
    %20 = arith.addf %12, %19 : vector<8x128xf32>
    %cst_16 = arith.constant dense<0.000000e+00> : vector<8x128xf32>
    %21 = tpu.matmul %16, %8, %cst_16 {dimension_numbers = #tpu.dot_dimension_numbers<[1], [0], [0], [1], [0, 0, 1, 1], [], []>} : vector<8x128xf32>, vector<128x128xf32>, vector<8x128xf32> -> vector<8x128xf32>
    %22 = arith.addf %13, %21 : vector<8x128xf32>
    %cst_17 = arith.constant dense<0.000000e+00> : vector<8x128xf32>
    %23 = tpu.matmul %16, %6, %cst_17 {dimension_numbers = #tpu.dot_dimension_numbers<[1], [0], [0], [1], [0, 0, 1, 1], [], []>} : vector<8x128xf32>, vector<128x128xf32>, vector<8x128xf32> -> vector<8x128xf32>
    %24 = arith.subf %14, %23 : vector<8x128xf32>
    %25 = vector.extract_strided_slice %0 {offsets = [0, 2, 0], sizes = [8, 1, 128], strides = [1, 1, 1]} : vector<8x4x128xf32> to vector<8x1x128xf32>
    %26 = vector.shape_cast %25 : vector<8x1x128xf32> to vector<8x128xf32>
    %cst_18 = arith.constant dense<0.000000e+00> : vector<8x128xf32>
    %27 = tpu.matmul %26, %6, %cst_18 {dimension_numbers = #tpu.dot_dimension_numbers<[1], [0], [0], [1], [0, 0, 1, 1], [], []>} : vector<8x128xf32>, vector<128x128xf32>, vector<8x128xf32> -> vector<8x128xf32>
    %28 = arith.subf %18, %27 : vector<8x128xf32>
    %cst_19 = arith.constant dense<0.000000e+00> : vector<8x128xf32>
    %29 = tpu.matmul %26, %8, %cst_19 {dimension_numbers = #tpu.dot_dimension_numbers<[1], [0], [0], [1], [0, 0, 1, 1], [], []>} : vector<8x128xf32>, vector<128x128xf32>, vector<8x128xf32> -> vector<8x128xf32>
    %30 = arith.subf %20, %29 : vector<8x128xf32>
    %cst_20 = arith.constant dense<0.000000e+00> : vector<8x128xf32>
    %31 = tpu.matmul %26, %2, %cst_20 {dimension_numbers = #tpu.dot_dimension_numbers<[1], [0], [0], [1], [0, 0, 1, 1], [], []>} : vector<8x128xf32>, vector<128x128xf32>, vector<8x128xf32> -> vector<8x128xf32>
    %32 = arith.addf %22, %31 : vector<8x128xf32>
    %cst_21 = arith.constant dense<0.000000e+00> : vector<8x128xf32>
    %33 = tpu.matmul %26, %4, %cst_21 {dimension_numbers = #tpu.dot_dimension_numbers<[1], [0], [0], [1], [0, 0, 1, 1], [], []>} : vector<8x128xf32>, vector<128x128xf32>, vector<8x128xf32> -> vector<8x128xf32>
    %34 = arith.addf %24, %33 : vector<8x128xf32>
    %35 = vector.extract_strided_slice %0 {offsets = [0, 3, 0], sizes = [8, 1, 128], strides = [1, 1, 1]} : vector<8x4x128xf32> to vector<8x1x128xf32>
    %36 = vector.shape_cast %35 : vector<8x1x128xf32> to vector<8x128xf32>
    %cst_22 = arith.constant dense<0.000000e+00> : vector<8x128xf32>
    %37 = tpu.matmul %36, %8, %cst_22 {dimension_numbers = #tpu.dot_dimension_numbers<[1], [0], [0], [1], [0, 0, 1, 1], [], []>} : vector<8x128xf32>, vector<128x128xf32>, vector<8x128xf32> -> vector<8x128xf32>
    %38 = arith.subf %28, %37 : vector<8x128xf32>
    %cst_23 = arith.constant dense<0.000000e+00> : vector<8x128xf32>
    %39 = tpu.matmul %36, %6, %cst_23 {dimension_numbers = #tpu.dot_dimension_numbers<[1], [0], [0], [1], [0, 0, 1, 1], [], []>} : vector<8x128xf32>, vector<128x128xf32>, vector<8x128xf32> -> vector<8x128xf32>
    %40 = arith.addf %30, %39 : vector<8x128xf32>
    %cst_24 = arith.constant dense<0.000000e+00> : vector<8x128xf32>
    %41 = tpu.matmul %36, %4, %cst_24 {dimension_numbers = #tpu.dot_dimension_numbers<[1], [0], [0], [1], [0, 0, 1, 1], [], []>} : vector<8x128xf32>, vector<128x128xf32>, vector<8x128xf32> -> vector<8x128xf32>
    %42 = arith.subf %32, %41 : vector<8x128xf32>
    %cst_25 = arith.constant dense<0.000000e+00> : vector<8x128xf32>
    %43 = tpu.matmul %36, %2, %cst_25 {dimension_numbers = #tpu.dot_dimension_numbers<[1], [0], [0], [1], [0, 0, 1, 1], [], []>} : vector<8x128xf32>, vector<128x128xf32>, vector<8x128xf32> -> vector<8x128xf32>
    %44 = arith.addf %34, %43 : vector<8x128xf32>
    %c0_26 = arith.constant 0 : index
    %c0_27 = arith.constant 0 : index
    %c0_28 = arith.constant 0 : index
    %45 = vector.load %arg5[%c0_26, %c0_27, %c0_28] : memref<1x4x128xf32, #tpu.memory_space<vmem>>, vector<1x4x128xf32>
    %46 = vector.extract_strided_slice %45 {offsets = [0, 0, 0], sizes = [1, 1, 128], strides = [1, 1, 1]} : vector<1x4x128xf32> to vector<1x1x128xf32>
    %47 = vector.shape_cast %46 : vector<1x1x128xf32> to vector<1x128xf32>
    %48 = vector.broadcast %47 : vector<1x128xf32> to vector<8x128xf32>
    %49 = arith.addf %38, %48 : vector<8x128xf32>
    %c0_29 = arith.constant 0 : index
    %c0_30 = arith.constant 0 : index
    %c0_31 = arith.constant 0 : index
    %50 = vector.load %arg6[%c0_29, %c0_30, %c0_31] : memref<8x4x128xf32, #tpu.memory_space<vmem>>, vector<8x1x128xf32>
    %51 = vector.shape_cast %50 : vector<8x1x128xf32> to vector<8x128xf32>
    %52 = vector.shape_cast %49 : vector<8x128xf32> to vector<8x1x128xf32>
    tpu.vector_store %arg6[%c0_29, %c0_30, %c0_31], %52 {strides = array<i32>} : memref<8x4x128xf32, #tpu.memory_space<vmem>>, vector<8x1x128xf32>,
    %53 = vector.extract_strided_slice %45 {offsets = [0, 1, 0], sizes = [1, 1, 128], strides = [1, 1, 1]} : vector<1x4x128xf32> to vector<1x1x128xf32>
    %54 = vector.shape_cast %53 : vector<1x1x128xf32> to vector<1x128xf32>
    %55 = vector.broadcast %54 : vector<1x128xf32> to vector<8x128xf32>
    %56 = arith.addf %40, %55 : vector<8x128xf32>
    %c0_32 = arith.constant 0 : index
    %c1_33 = arith.constant 1 : index
    %c0_34 = arith.constant 0 : index
    %57 = vector.load %arg6[%c0_32, %c1_33, %c0_34] : memref<8x4x128xf32, #tpu.memory_space<vmem>>, vector<8x1x128xf32>
    %58 = vector.shape_cast %57 : vector<8x1x128xf32> to vector<8x128xf32>
    %59 = vector.shape_cast %56 : vector<8x128xf32> to vector<8x1x128xf32>
    tpu.vector_store %arg6[%c0_32, %c1_33, %c0_34], %59 {strides = array<i32>} : memref<8x4x128xf32, #tpu.memory_space<vmem>>, vector<8x1x128xf32>,
    %60 = vector.extract_strided_slice %45 {offsets = [0, 2, 0], sizes = [1, 1, 128], strides = [1, 1, 1]} : vector<1x4x128xf32> to vector<1x1x128xf32>
    %61 = vector.shape_cast %60 : vector<1x1x128xf32> to vector<1x128xf32>
    %62 = vector.broadcast %61 : vector<1x128xf32> to vector<8x128xf32>
    %63 = arith.addf %42, %62 : vector<8x128xf32>
    %c0_35 = arith.constant 0 : index
    %c2_36 = arith.constant 2 : index
    %c0_37 = arith.constant 0 : index
    %64 = vector.load %arg6[%c0_35, %c2_36, %c0_37] : memref<8x4x128xf32, #tpu.memory_space<vmem>>, vector<8x1x128xf32>
    %65 = vector.shape_cast %64 : vector<8x1x128xf32> to vector<8x128xf32>
    %66 = vector.shape_cast %63 : vector<8x128xf32> to vector<8x1x128xf32>
    tpu.vector_store %arg6[%c0_35, %c2_36, %c0_37], %66 {strides = array<i32>} : memref<8x4x128xf32, #tpu.memory_space<vmem>>, vector<8x1x128xf32>,
    %67 = vector.extract_strided_slice %45 {offsets = [0, 3, 0], sizes = [1, 1, 128], strides = [1, 1, 1]} : vector<1x4x128xf32> to vector<1x1x128xf32>
    %68 = vector.shape_cast %67 : vector<1x1x128xf32> to vector<1x128xf32>
    %69 = vector.broadcast %68 : vector<1x128xf32> to vector<8x128xf32>
    %70 = arith.addf %44, %69 : vector<8x128xf32>
    %c0_38 = arith.constant 0 : index
    %c3_39 = arith.constant 3 : index
    %c0_40 = arith.constant 0 : index
    %71 = vector.load %arg6[%c0_38, %c3_39, %c0_40] : memref<8x4x128xf32, #tpu.memory_space<vmem>>, vector<8x1x128xf32>
    %72 = vector.shape_cast %71 : vector<8x1x128xf32> to vector<8x128xf32>
    %73 = vector.shape_cast %70 : vector<8x128xf32> to vector<8x1x128xf32>
    tpu.vector_store %arg6[%c0_38, %c3_39, %c0_40], %73 {strides = array<i32>} : memref<8x4x128xf32, #tpu.memory_space<vmem>>, vector<8x1x128xf32>,
    return
  }
  func.func @transform_0(%arg0: i32, %arg1: i32, %arg2: i32) -> (i32, i32, i32) {
    %c0_i32 = arith.constant 0 : i32
    %c0_i32_0 = arith.constant 0 : i32
    return %arg0, %c0_i32, %arg2 : i32, i32, i32
  }
  func.func @transform_1(%arg0: i32, %arg1: i32, %arg2: i32) -> (i32, i32, i32) {
    %c0_i32 = arith.constant 0 : i32
    %c0_i32_0 = arith.constant 0 : i32
    return %c0_i32, %arg2, %arg1 : i32, i32, i32
  }
  func.func @transform_2(%arg0: i32, %arg1: i32, %arg2: i32) -> (i32, i32, i32) {
    %c0_i32 = arith.constant 0 : i32
    %c0_i32_0 = arith.constant 0 : i32
    %c0_i32_1 = arith.constant 0 : i32
    return %c0_i32, %c0_i32_0, %arg1 : i32, i32, i32
  }
  func.func @transform_3(%arg0: i32, %arg1: i32, %arg2: i32) -> (i32, i32, i32) {
    %c0_i32 = arith.constant 0 : i32
    %c0_i32_0 = arith.constant 0 : i32
    return %arg0, %c0_i32, %arg1 : i32, i32, i32
  }
}

</mosaic_0001>

<bundles_post_ra>
// kernel: tpu_custom_call.1
= control target key start
LH: loop header
LB: loop body
LE: loop exit
PB: predicated region body
PF: predicated region fallthrough
CT: control target
= control target key end

     0   :  { %8 = vsyncpa [#allocation3], 0  ;;  %s1295_s0 = inlined_call_operand.hbm [shape: f32[8,4,128], index: 0, kind: input, shape index: {}]   ;;  %s1296_s1 = inlined_call_operand.hbm [shape: f32[4,128,128], index: 1, kind: input, shape index: {}]   ;;  %s1297_s2 = inlined_call_operand.hbm [shape: f32[1,4,128], index: 2, kind: input, shape index: {}]   ;;  %s1298_s3 = inlined_call_operand.hbm [shape: f32[8,4,128], index: 3, kind: output, shape index: {}]  }
   0x1   :  { %9 = vsyncpa [#allocation6], 0  ;;  %s28_s14 = sshll.u32 %s1296_s1, 4  ;;  %s29_s14 = int_to_ptr.hbm [resolvable:$true] %s28_s14 }
   0x2   :  { %10 = vsyncpa [#allocation4], 0  ;;  %s771_s15 = smov [#allocation5]   ;;  %s15_s19 = sshll.u32 %s1295_s0, 4  ;;  %s16_s19 = int_to_ptr.hbm [resolvable:$true] %s15_s19 }
   0x3   :  { %s30_s16 = sshll.u32 %s771_s15, 4  ;;  %s772_s20 = smov 128   ;;  %s31_s16 = int_to_ptr.vmem [resolvable:$true] %s30_s16 }
   0x4   :  { %s773_s21 = smov 8   ;;  %s774_s22 = smov [#allocation2]  }
   0x5   :  { %36 = dma.hbm_to_vmem [thread:$0]  %s29_s14, 8192, %s31_s16, [#allocation6], %s772_s20, %s772_s20, %s773_s21  }
   0x6   :  { %s17_s23 = sshll.u32 %s774_s22, 4  ;;  %s775_s24 = smov 64   ;;  %s18_s23 = int_to_ptr.vmem [resolvable:$true] %s17_s23 }
   0x7   :  { %s776_s25 = smov 4   ;;  %s42_s27 = sshll.u32 %s1297_s2, 4  ;;  %s43_s27 = int_to_ptr.hbm [resolvable:$true] %s42_s27 }
   0x8   :  { %23 = dma.hbm_to_vmem [thread:$0]  %s16_s19, 512, %s18_s23, [#allocation3], %s775_s24, %s775_s24, %s776_s25  }
   0x9   :  { %s777_s28 = smov [#allocation7]  }
   0xa   :  { %s44_s0 = sshll.u32 %s777_s28, 4  ;;  %s45_s0 = int_to_ptr.vmem [resolvable:$true] %s44_s0 }
   0xb   :  { %47 = dma.hbm_to_vmem [thread:$0]  %s43_s27, 64, %s45_s0, [#allocation6]  }
   0xc   :  { %765 = dma.done.wait [#allocation3], 512  }
   0xd   :  { %766 = vsyncadd [#allocation3], 4294966784 }
   0xe   :  { %767 = dma.done.wait [#allocation6], 8256  }
   0xf   :  { %768 = vsyncadd [#allocation6], 4294959040  ;;  %v811_v0 = vld [vmem:[#allocation5 + $0x78] sm:$0xff]  ;;  %v819_v3 = vld [vmem:[#allocation5 + $0x70] sm:$0xff]  ;;  %vm144_vm0 = vcmask 1041409   ;;  %vm147_vm1 = vcmask 1042434  }
  0x10   :  { %v813_v1 = vld [vmem:[#allocation5 + $0x1f8] sm:$0xff]  ;;  %165 = vmatpush.msra.mxu0 %v811_v0  ;;  %v821_v4 = vld [vmem:[#allocation5 + $0x1f0] sm:$0xff]  ;;  %241 = vmatpush.msra.mxu3 %v811_v0  ;;  %v827_v6 = vld [vmem:[#allocation5 + $0x68] sm:$0xff]  ;;  %vm150_vm2 = vcmask 1043459   ;;  %vm153_vm3 = vcmask 1044484   ;;  %vm156_vm4 = vcmask 1045509  }
  0x11   :  { %v815_v2 = vld [vmem:[#allocation5 + $0xf8] sm:$0xff]  ;;  %185 = vmatpush.msra.mxu1 %v813_v1  ;;  %v823_v5 = vld [vmem:[#allocation5 + $0xf0] sm:$0xff]  ;;  %v829_v7 = vld [vmem:[#allocation5 + $0x1e8] sm:$0xff]  ;;  %vm159_vm5 = vcmask 1046534   ;;  %vm162_vm6 = vcmask 1047559   ;;  %s778_s2 = smov [#allocation8]  }
  0x12   :  { %220 = vmatpush.msra.mxu2 %v815_v2  ;;  %166 = vmatpush.msra.mxu0 %v819_v3  ;;  %v833_v8 = vld [vmem:[#allocation5 + $0xe8] sm:$0xff]  ;;  %v837_v9 = vld [vmem:[#allocation5 + $0x60] sm:$0xff]  ;;  %v847_v12 = vld [vmem:[#allocation5 + $0x58] sm:$0xff]  ;;  %s645_s29 = sshll.u32 %s778_s2, 4  ;;  %s647_s5 = sshll.u32 %s1298_s3, 4  ;;  %s646_s29 = int_to_ptr.vmem [resolvable:$true] %s645_s29  ;;  %s648_s5 = int_to_ptr.hbm [resolvable:$true] %s647_s5 }
  0x13   :  { %186 = vmatpush.msra.mxu1 %v821_v4  ;;  %242 = vmatpush.msra.mxu3 %v819_v3  ;;  %v839_v10 = vld [vmem:[#allocation5 + $0x1e0] sm:$0xff]  ;;  %1334 = vst [vmem:[#allocation12_spill] sm:$0xff] %v847_v12  ;;  %v849_v13 = vld [vmem:[#allocation5 + $0x1d8] sm:$0xff]  ;;  %v857_v15 = vld [vmem:[#allocation5 + $0x50] sm:$0xff] }
  0x14   :  { %221 = vmatpush.msra.mxu2 %v823_v5  ;;  %167 = vmatpush.msra.mxu0 %v827_v6  ;;  %v843_v11 = vld [vmem:[#allocation5 + $0xe0] sm:$0xff]  ;;  %v853_v14 = vld [vmem:[#allocation5 + $0xd8] sm:$0xff]  ;;  %1335 = vst [vmem:[#allocation13_spill] sm:$0xff] %v857_v15  ;;  %v859_v16 = vld [vmem:[#allocation5 + $0x1d0] sm:$0xff] }
  0x15   :  { %187 = vmatpush.msra.mxu1 %v829_v7  ;;  %243 = vmatpush.msra.mxu3 %v827_v6  ;;  %1336 = vst [vmem:[#allocation14_spill] sm:$0xff] %v859_v16  ;;  %v863_v17 = vld [vmem:[#allocation5 + $0xd0] sm:$0xff]  ;;  %v867_v18 = vld [vmem:[#allocation5 + $0x48] sm:$0xff]  ;;  %v877_v21 = vld [vmem:[#allocation5 + $0x40] sm:$0xff] }
  0x16   :  { %222 = vmatpush.msra.mxu2 %v833_v8  ;;  %168 = vmatpush.msra.mxu0 %v837_v9  ;;  %v869_v19 = vld [vmem:[#allocation5 + $0x1c8] sm:$0xff]  ;;  %1337 = vst [vmem:[#allocation15_spill] sm:$0xff] %v877_v21  ;;  %v879_v22 = vld [vmem:[#allocation5 + $0x1c0] sm:$0xff]  ;;  %v887_v24 = vld [vmem:[#allocation5 + $0x38] sm:$0xff] }
  0x17   :  { %188 = vmatpush.msra.mxu1 %v839_v10  ;;  %244 = vmatpush.msra.mxu3 %v837_v9  ;;  %v873_v20 = vld [vmem:[#allocation5 + $0xc8] sm:$0xff]  ;;  %v883_v23 = vld [vmem:[#allocation5 + $0xc0] sm:$0xff]  ;;  %1338 = vst [vmem:[#allocation16_spill] sm:$0xff] %v887_v24  ;;  %v889_v25 = vld [vmem:[#allocation5 + $0x1b8] sm:$0xff] }
  0x18   :  { %223 = vmatpush.msra.mxu2 %v843_v11  ;;  %169 = vmatpush.msra.mxu0 %v847_v12  ;;  %v893_v26 = vld [vmem:[#allocation5 + $0xb8] sm:$0xff]  ;;  %v897_v27 = vld [vmem:[#allocation5 + $0x30] sm:$0xff]  ;;  %v907_v30 = vld [vmem:[#allocation5 + $0x28] sm:$0xff] }
  0x19   :  { %189 = vmatpush.msra.mxu1 %v849_v13  ;;  %245 = vmatpush.msra.mxu3 %v847_v12  ;;  %1339 = vst [vmem:[#allocation17_spill] sm:$0xff] %v897_v27  ;;  %v899_v28 = vld [vmem:[#allocation5 + $0x1b0] sm:$0xff]  ;;  %v909_v31 = vld [vmem:[#allocation5 + $0x1a8] sm:$0xff]  ;;  %v917_v33 = vld [vmem:[#allocation5 + $0x20] sm:$0xff] }
  0x1a   :  { %224 = vmatpush.msra.mxu2 %v853_v14  ;;  %170 = vmatpush.msra.mxu0 %v857_v15  ;;  %v903_v29 = vld [vmem:[#allocation5 + $0xb0] sm:$0xff]  ;;  %1340 = vst [vmem:[#allocation18_spill] sm:$0xff] %v907_v30  ;;  %v913_v32 = vld [vmem:[#allocation5 + $0xa8] sm:$0xff]  ;;  %v919_v34 = vld [vmem:[#allocation5 + $0x1a0] sm:$0xff] }
  0x1b   :  { %190 = vmatpush.msra.mxu1 %v859_v16  ;;  %246 = vmatpush.msra.mxu3 %v857_v15  ;;  %1341 = vst [vmem:[#allocation19_spill] sm:$0xff] %v913_v32  ;;  %v923_v35 = vld [vmem:[#allocation5 + $0xa0] sm:$0xff]  ;;  %v927_v36 = vld [vmem:[#allocation5 + $0x18] sm:$0xff]  ;;  %v937_v39 = vld [vmem:[#allocation5 + $0x10] sm:$0xff] }
  0x1c   :  { %225 = vmatpush.msra.mxu2 %v863_v17  ;;  %171 = vmatpush.msra.mxu0 %v867_v18  ;;  %1342 = vst [vmem:[#allocation20_spill] sm:$0xff] %v917_v33  ;;  %v929_v37 = vld [vmem:[#allocation5 + $0x198] sm:$0xff]  ;;  %v939_v40 = vld [vmem:[#allocation5 + $0x190] sm:$0xff]  ;;  %v947_v42 = vld [vmem:[#allocation5 + $0x8] sm:$0xff] }
  0x1d   :  { %191 = vmatpush.msra.mxu1 %v869_v19  ;;  %247 = vmatpush.msra.mxu3 %v867_v18  ;;  %1343 = vst [vmem:[#allocation21_spill] sm:$0xff] %v927_v36  ;;  %v933_v38 = vld [vmem:[#allocation5 + $0x98] sm:$0xff]  ;;  %v943_v41 = vld [vmem:[#allocation5 + $0x90] sm:$0xff]  ;;  %v949_v43 = vld [vmem:[#allocation5 + $0x188] sm:$0xff] }
  0x1e   :  { %226 = vmatpush.msra.mxu2 %v873_v20  ;;  %172 = vmatpush.msra.mxu0 %v877_v21  ;;  %1344 = vst [vmem:[#allocation22_spill] sm:$0xff] %v937_v39  ;;  %v953_v44 = vld [vmem:[#allocation5 + $0x88] sm:$0xff]  ;;  %v957_v45 = vld [vmem:[#allocation5] sm:$0xff]  ;;  %v971_v49 = vld [vmem:[#allocation5 + $0x178] sm:$0xff] }
  0x1f   :  { %192 = vmatpush.msra.mxu1 %v879_v22  ;;  %248 = vmatpush.msra.mxu3 %v877_v21  ;;  %1345 = vst [vmem:[#allocation23_spill] sm:$0xff] %v947_v42  ;;  %v959_v46 = vld [vmem:[#allocation5 + $0x180] sm:$0xff]  ;;  %v975_v50 = vld [vmem:[#allocation2 + $0x8] sm:$0xf]  ;;  %v980_v52 = vld [vmem:[#allocation5 + $0x170] sm:$0xff] }
  0x20   :  { %227 = vmatpush.msra.mxu2 %v883_v23  ;;  %173 = vmatpush.msra.mxu0 %v887_v24  ;;  %1346 = vst [vmem:[#allocation24_spill] sm:$0xff] %v957_v45  ;;  %v963_v47 = vld [vmem:[#allocation5 + $0x80] sm:$0xff]  ;;  %v988_v54 = vld [vmem:[#allocation5 + $0x168] sm:$0xff]  ;;  %v207_v56 = vrot.slane %v975_v50, 7  ;;  %v1003_v59 = vld [vmem:[#allocation2 + $0x10] sm:$0xf] }
  0x21   :  { %193 = vmatpush.msra.mxu1 %v889_v25  ;;  %249 = vmatpush.msra.mxu3 %v887_v24  ;;  %v965_v48 = vld [vmem:[#allocation2] sm:$0xf]  ;;  %1347 = vst [vmem:[#allocation25_spill] sm:$0xff] %v975_v50  ;;  %v982_v53 = vld [vmem:[#allocation2 + $0x4] sm:$0xf]  ;;  %v1009_v62 = vld [vmem:[#allocation5 + $0x158] sm:$0xff] }
  0x22   :  { %228 = vmatpush.msra.mxu2 %v893_v26  ;;  %174 = vmatpush.msra.mxu0 %v897_v27  ;;  %v205_v51 = vrot.slane %v965_v48, 1  ;;  %v990_v55 = vld [vmem:[#allocation2 + $0xc] sm:$0xf]  ;;  %v999_v58 = vld [vmem:[#allocation5 + $0x160] sm:$0xff]  ;;  %1349 = vst [vmem:[#allocation27_spill] sm:$0xff] %v1003_v59  ;;  %v143_v61 = vrot.slane %v982_v53, 7 }
  0x23   :  { %194 = vmatpush.msra.mxu1 %v899_v28  ;;  %250 = vmatpush.msra.mxu3 %v897_v27  ;;  %1348 = vst [vmem:[#allocation26_spill] sm:$0xff] %v990_v55  ;;  %v209_v60 = vrot.slane %v990_v55, 6  ;;  %v149_v27 = vrot.slane %v990_v55, 5  ;;  %v1047_v24 = vld [vmem:[#allocation5 + $0x138] sm:$0xff]  ;;  %v152_v55 = vrot.slane %v1003_v59, 4 }
  0x24   :  { %229 = vmatpush.msra.mxu2 %v903_v29  ;;  %175 = vmatpush.msra.mxu0 %v907_v30  ;;  %v206_v57 = vsel %vm144_vm0, %v982_v53, %v205_v51  ;;  %v1016_v51 = vld [vmem:[#allocation5 + $0x150] sm:$0xff]  ;;  %1354 = vst [vmem:[#allocation32_spill] sm:$0xff] %v1047_v24 }
  0x25   :  { %195 = vmatpush.msra.mxu1 %v909_v31  ;;  %251 = vmatpush.msra.mxu3 %v907_v30  ;;  %v208_v63 = vsel %vm147_vm1, %v207_v56, %v206_v57  ;;  %1350 = vst [vmem:[#allocation28_spill] sm:$0xff] %v1016_v51  ;;  %v145_v57 = vsel %vm144_vm0, %v143_v61, %v965_v48 }
  0x26   :  { %230 = vmatpush.msra.mxu2 %v913_v32  ;;  %176 = vmatpush.msra.mxu0 %v917_v33  ;;  %v210_v56 = vsel %vm150_vm2, %v209_v60, %v208_v63  ;;  %v1039_v60 = vld [vmem:[#allocation5 + $0x140] sm:$0xff] }
  0x27   :  { %196 = vmatpush.msra.mxu1 %v919_v34  ;;  %252 = vmatpush.msra.mxu3 %v917_v33  ;;  %v1033_v33 = vld [vmem:[#allocation2 + $0x18] sm:$0xf]  ;;  %1353 = vst [vmem:[#allocation31_spill] sm:$0xff] %v1039_v60 }
  0x28   :  { %231 = vmatpush.msra.mxu2 %v923_v35  ;;  %177 = vmatpush.msra.mxu0 %v927_v36  ;;  %v215_v21 = vrot.slane %v1033_v33, 3 }
  0x29   :  { %197 = vmatpush.msra.mxu1 %v929_v37  ;;  %253 = vmatpush.msra.mxu3 %v927_v36  ;;  %v1029_v36 = vld [vmem:[#allocation5 + $0x148] sm:$0xff] }
  0x2a   :  { %232 = vmatpush.msra.mxu2 %v933_v38  ;;  %178 = vmatpush.msra.mxu0 %v937_v39  ;;  %1352 = vst [vmem:[#allocation30_spill] sm:$0xff] %v1029_v36 }
  0x2b   :  { %198 = vmatpush.msra.mxu1 %v939_v40  ;;  %254 = vmatpush.msra.mxu3 %v937_v39  ;;  %v146_v39 = vrot.slane %v975_v50, 6  ;;  %v1049_v50 = vld [vmem:[#allocation2 + $0x1c] sm:$0xf] }
  0x2c   :  { %233 = vmatpush.msra.mxu2 %v943_v41  ;;  %179 = vmatpush.msra.mxu0 %v947_v42 }
  0x2d   :  { %199 = vmatpush.msra.mxu1 %v949_v43  ;;  %255 = vmatpush.msra.mxu3 %v947_v42  ;;  %v211_v42 = vrot.slane %v1003_v59, 5  ;;  %v148_v63 = vsel %vm147_vm1, %v146_v39, %v145_v57  ;;  %v217_v57 = vrot.slane %v1049_v50, 2 }
  0x2e   :  { %234 = vmatpush.msra.mxu2 %v953_v44  ;;  %180 = vmatpush.msra.mxu0 %v957_v45 }
  0x2f   :  { %200 = vmatpush.msra.mxu1 %v959_v46  ;;  %256 = vmatpush.msra.mxu3 %v957_v45  ;;  %v1018_v45 = vld [vmem:[#allocation2 + $0x14] sm:$0xf]  ;;  %v212_v61 = vsel %vm153_vm3, %v211_v42, %v210_v56  ;;  %v151_v42 = vsel %vm150_vm2, %v149_v27, %v148_v63  ;;  %v1075_v63 = vld [vmem:[#allocation5 + $0x120] sm:$0xff] }
  0x30   :  { %235 = vmatpush.msra.mxu2 %v963_v47  ;;  %261 = vmatpush.msrb.mxu0 %v815_v2  ;;  %1351 = vst [vmem:[#allocation29_spill] sm:$0xff] %v1018_v45  ;;  %v213_v30 = vrot.slane %v1018_v45, 4  ;;  %v1059_v56 = vld [vmem:[#allocation5 + $0x130] sm:$0xff]  ;;  %v155_v59 = vrot.slane %v1018_v45, 3  ;;  %v158_v45 = vrot.slane %v1033_v33, 2 }
  0x31   :  { %281 = vmatpush.msrb.mxu1 %v813_v1  ;;  %321 = vmatpush.msrb.mxu3 %v971_v49  ;;  %1355 = vst [vmem:[#allocation33_spill] sm:$0xff] %v1059_v56 }
  0x32   :  { %301 = vmatpush.msrb.mxu2 %v971_v49  ;;  %262 = vmatpush.msrb.mxu0 %v823_v5  ;;  %v214_v39 = vsel %vm156_vm4, %v213_v30, %v212_v61  ;;  %v1067_v30 = vld [vmem:[#allocation5 + $0x128] sm:$0xff]  ;;  %v154_v61 = vsel %vm153_vm3, %v152_v55, %v151_v42  ;;  %v161_v42 = vrot.slane %v1049_v50, 1 }
  0x33   :  { %282 = vmatpush.msrb.mxu1 %v821_v4  ;;  %322 = vmatpush.msrb.mxu3 %v980_v52  ;;  %v216_v27 = vsel %vm159_vm5, %v215_v21, %v214_v39  ;;  %v157_v55 = vsel %vm156_vm4, %v155_v59, %v154_v61  ;;  %v1086_v39 = vld [vmem:[#allocation5 + $0x118] sm:$0xff] }
  0x34   :  { %302 = vmatpush.msrb.mxu2 %v980_v52  ;;  %263 = vmatpush.msrb.mxu0 %v833_v8  ;;  %v1081_v21 = vsel %vm162_vm6, %v217_v57, %v216_v27  ;;  %v1093_v57 = vld [vmem:[#allocation5 + $0x110] sm:$0xff]  ;;  %v160_v59 = vsel %vm159_vm5, %v158_v45, %v157_v55  ;;  %v1100_v27 = vld [vmem:[#allocation5 + $0x108] sm:$0xff]  ;;  %v1111_v45 = vld [vmem:[#allocation5 + $0x100] sm:$0xff]  ;;  %v342_v55 = vrot.slane %v965_v48, 2 }
  0x35   :  { %283 = vmatpush.msrb.mxu1 %v829_v7  ;;  %323 = vmatpush.msrb.mxu3 %v988_v54  ;;  %v1105_v61 = vsel %vm162_vm6, %v161_v42, %v160_v59  ;;  %v343_v42 = vrot.slane %v982_v53, 1 }
  0x36   :  { %303 = vmatpush.msrb.mxu2 %v988_v54  ;;  %264 = vmatpush.msrb.mxu0 %v843_v11 }
  0x37   :  { %284 = vmatpush.msrb.mxu1 %v839_v10  ;;  %324 = vmatpush.msrb.mxu3 %v999_v58  ;;  %v344_v59 = vsel %vm144_vm0, %v343_v42, %v342_v55  ;;  %v1359_v55 = vld [vmem:[#allocation16_spill] sm:$0xff]  ;;  %v1360_v42 = vld [vmem:[#allocation27_spill] sm:$0xff] }
  0x38   :  { %304 = vmatpush.msrb.mxu2 %v999_v58  ;;  %265 = vmatpush.msrb.mxu0 %v853_v14 }
  0x39   :  { %285 = vmatpush.msrb.mxu1 %v849_v13  ;;  %325 = vmatpush.msrb.mxu3 %v1009_v62 }
  0x3a   :  { %305 = vmatpush.msrb.mxu2 %v1009_v62  ;;  %266 = vmatpush.msrb.mxu0 %v863_v17 }
  0x3b   :  { %286 = vmatpush.msrb.mxu1 %v859_v16  ;;  %326 = vmatpush.msrb.mxu3 %v1016_v51 }
  0x3c   :  { %306 = vmatpush.msrb.mxu2 %v1016_v51  ;;  %267 = vmatpush.msrb.mxu0 %v873_v20 }
  0x3d   :  { %287 = vmatpush.msrb.mxu1 %v869_v19  ;;  %327 = vmatpush.msrb.mxu3 %v1029_v36 }
  0x3e   :  { %307 = vmatpush.msrb.mxu2 %v1029_v36  ;;  %268 = vmatpush.msrb.mxu0 %v883_v23 }
  0x3f   :  { %288 = vmatpush.msrb.mxu1 %v879_v22  ;;  %328 = vmatpush.msrb.mxu3 %v1039_v60 }
  0x40   :  { %308 = vmatpush.msrb.mxu2 %v1039_v60  ;;  %269 = vmatpush.msrb.mxu0 %v893_v26 }
  0x41   :  { %289 = vmatpush.msrb.mxu1 %v889_v25  ;;  %329 = vmatpush.msrb.mxu3 %v1047_v24 }
  0x42   :  { %309 = vmatpush.msrb.mxu2 %v1047_v24  ;;  %270 = vmatpush.msrb.mxu0 %v903_v29 }
  0x43   :  { %290 = vmatpush.msrb.mxu1 %v899_v28  ;;  %330 = vmatpush.msrb.mxu3 %v1059_v56 }
  0x44   :  { %310 = vmatpush.msrb.mxu2 %v1059_v56  ;;  %271 = vmatpush.msrb.mxu0 %v913_v32 }
  0x45   :  { %291 = vmatpush.msrb.mxu1 %v909_v31  ;;  %331 = vmatpush.msrb.mxu3 %v1067_v30 }
  0x46   :  { %311 = vmatpush.msrb.mxu2 %v1067_v30  ;;  %272 = vmatpush.msrb.mxu0 %v923_v35 }
  0x47   :  { %292 = vmatpush.msrb.mxu1 %v919_v34  ;;  %332 = vmatpush.msrb.mxu3 %v1075_v63 }
  0x48   :  { %312 = vmatpush.msrb.mxu2 %v1075_v63  ;;  %257 = vmatmul.f32.vlgmr.msra.gmra.mxu3 %v1081_v21 }
  0x49   :  { %273 = vmatpush.msrb.mxu0 %v933_v38  ;;  %293 = vmatpush.msrb.mxu1 %v929_v37 }
  0x4a   :  { %313 = vmatpush.msrb.mxu2 %v1086_v39  ;;  %333 = vmatpush.msrb.mxu3 %v1086_v39 }
  0x4b   :  { %274 = vmatpush.msrb.mxu0 %v943_v41  ;;  %294 = vmatpush.msrb.mxu1 %v939_v40 }
  0x4c   :  { %314 = vmatpush.msrb.mxu2 %v1093_v57  ;;  %334 = vmatpush.msrb.mxu3 %v1093_v57 }
  0x4d   :  { %275 = vmatpush.msrb.mxu0 %v953_v44  ;;  %295 = vmatpush.msrb.mxu1 %v949_v43 }
  0x4e   :  { %315 = vmatpush.msrb.mxu2 %v1100_v27  ;;  %335 = vmatpush.msrb.mxu3 %v1100_v27 }
  0x4f   :  { %181 = vmatmul.f32.vlgmr.msra.gmra.mxu0 %v1105_v61  ;;  %296 = vmatpush.msrb.mxu1 %v959_v46 }
  0x50   :  { %276 = vmatpush.msrb.mxu0 %v963_v47  ;;  %316 = vmatpush.msrb.mxu2 %v1111_v45 }
  0x51   :  { %336 = vmatpush.msrb.mxu3 %v1111_v45  ;;  %201 = vmatmul.f32.vlgmr.msra.gmra.mxu1 %v1105_v61 }
  0x52   :  { %236 = vmatmul.f32.vlgmr.msra.gmra.mxu2 %v1081_v21  ;;  %337 = vmatmul.f32.vlgmr.msrb.gmra.mxu3 %v1081_v21 }
  0x53   :  { %357 = vmatpush.msra.mxu0 %v971_v49  ;;  %378 = vmatpush.msra.mxu1 %v813_v1 }
  0x54   :  { %399 = vmatpush.msra.mxu2 %v811_v0  ;;  %420 = vmatpush.msra.mxu3 %v815_v2 }
  0x55   :  { %358 = vmatpush.msra.mxu0 %v980_v52  ;;  %379 = vmatpush.msra.mxu1 %v821_v4 }
  0x56   :  { %400 = vmatpush.msra.mxu2 %v819_v3  ;;  %421 = vmatpush.msra.mxu3 %v823_v5 }
  0x57   :  { %359 = vmatpush.msra.mxu0 %v988_v54  ;;  %380 = vmatpush.msra.mxu1 %v829_v7 }
  0x58   :  { %401 = vmatpush.msra.mxu2 %v827_v6  ;;  %422 = vmatpush.msra.mxu3 %v833_v8 }
  0x59   :  { %277 = vmatmul.f32.vlgmr.msrb.gmra.mxu0 %v1105_v61  ;;  %381 = vmatpush.msra.mxu1 %v839_v10 }
  0x5a   :  { %360 = vmatpush.msra.mxu0 %v999_v58  ;;  %402 = vmatpush.msra.mxu2 %v837_v9 }
  0x5b   :  { %423 = vmatpush.msra.mxu3 %v843_v11  ;;  %382 = vmatpush.msra.mxu1 %v849_v13 }
  0x5c   :  { %361 = vmatpush.msra.mxu0 %v1009_v62  ;;  %403 = vmatpush.msra.mxu2 %v847_v12  ;;  %v1357_v12 = vld [vmem:[#allocation15_spill] sm:$0xff] }
  0x5d   :  { %424 = vmatpush.msra.mxu3 %v853_v14  ;;  %383 = vmatpush.msra.mxu1 %v859_v16 }
  0x5e   :  { %362 = vmatpush.msra.mxu0 %v1016_v51  ;;  %404 = vmatpush.msra.mxu2 %v857_v15  ;;  %v1356_v51 = vld [vmem:[#allocation26_spill] sm:$0xff]  ;;  %v1358_v15 = vld [vmem:[#allocation25_spill] sm:$0xff] }
  0x5f   :  { %425 = vmatpush.msra.mxu3 %v863_v17  ;;  %384 = vmatpush.msra.mxu1 %v869_v19  ;;  %v346_v16 = vrot.slane %v1356_v51, 7 }
  0x60   :  { %363 = vmatpush.msra.mxu0 %v1029_v36  ;;  %405 = vmatpush.msra.mxu2 %v867_v18  ;;  %v345_v36 = vsel %vm147_vm1, %v1358_v15, %v344_v59  ;;  %v1362_v59 = vld [vmem:[#allocation29_spill] sm:$0xff] }
  0x61   :  { %426 = vmatpush.msra.mxu3 %v873_v20  ;;  %385 = vmatpush.msra.mxu1 %v879_v22  ;;  %v347_v51 = vsel %vm150_vm2, %v346_v16, %v345_v36  ;;  %v1364_v16 = vld [vmem:[#allocation20_spill] sm:$0xff]  ;;  %v352_v36 = vrot.slane %v1033_v33, 4 }
  0x62   :  { %364 = vmatpush.msra.mxu0 %v1039_v60  ;;  %406 = vmatpush.msra.mxu2 %v1357_v12  ;;  %v348_v60 = vrot.slane %v1360_v42, 6  ;;  %v1361_v12 = vld [vmem:[#allocation17_spill] sm:$0xff] }
  0x63   :  { %427 = vmatpush.msra.mxu3 %v883_v23  ;;  %386 = vmatpush.msra.mxu1 %v889_v25 }
  0x64   :  { %365 = vmatpush.msra.mxu0 %v1047_v24  ;;  %407 = vmatpush.msra.mxu2 %v1359_v55  ;;  %v350_v55 = vrot.slane %v1362_v59, 5  ;;  %v1363_v24 = vld [vmem:[#allocation18_spill] sm:$0xff] }
  0x65   :  { %428 = vmatpush.msra.mxu3 %v893_v26  ;;  %387 = vmatpush.msra.mxu1 %v899_v28 }
  0x66   :  { %366 = vmatpush.msra.mxu0 %v1059_v56  ;;  %408 = vmatpush.msra.mxu2 %v1361_v12  ;;  %v349_v56 = vsel %vm153_vm3, %v348_v60, %v347_v51  ;;  %v354_v51 = vrot.slane %v1049_v50, 3 }
  0x67   :  { %429 = vmatpush.msra.mxu3 %v903_v29  ;;  %388 = vmatpush.msra.mxu1 %v909_v31 }
  0x68   :  { %367 = vmatpush.msra.mxu0 %v1067_v30  ;;  %409 = vmatpush.msra.mxu2 %v1363_v24  ;;  %v351_v24 = vsel %vm156_vm4, %v350_v55, %v349_v56  ;;  %v1367_v56 = vld [vmem:[#allocation23_spill] sm:$0xff]  ;;  %v1368_v55 = vld [vmem:[#allocation24_spill] sm:$0xff] }
  0x69   :  { %430 = vmatpush.msra.mxu3 %v913_v32  ;;  %389 = vmatpush.msra.mxu1 %v919_v34  ;;  %v1365_v32 = vld [vmem:[#allocation21_spill] sm:$0xff]  ;;  %v353_v60 = vsel %vm159_vm5, %v352_v36, %v351_v24  ;;  %v1381_v24 = vld [vmem:[#allocation18_spill] sm:$0xff] }
  0x6a   :  { %368 = vmatpush.msra.mxu0 %v1075_v63  ;;  %410 = vmatpush.msra.mxu2 %v1364_v16 }
  0x6b   :  { %431 = vmatpush.msra.mxu3 %v923_v35  ;;  %297 = vmatmul.f32.vlgmr.msrb.gmra.mxu1 %v1081_v21  ;;  %v1366_v21 = vld [vmem:[#allocation22_spill] sm:$0xff] }
  0x6c   :  { %369 = vmatpush.msra.mxu0 %v1086_v39  ;;  %390 = vmatpush.msra.mxu1 %v929_v37 }
  0x6d   :  { %411 = vmatpush.msra.mxu2 %v1365_v32  ;;  %432 = vmatpush.msra.mxu3 %v933_v38 }
  0x6e   :  { %317 = vmatmul.f32.vlgmr.msrb.gmra.mxu2 %v1105_v61  ;;  %370 = vmatpush.msra.mxu0 %v1093_v57  ;;  %v355_v61 = vsel %vm162_vm6, %v354_v51, %v353_v60 }
  0x6f   :  { %391 = vmatpush.msra.mxu1 %v939_v40  ;;  %412 = vmatpush.msra.mxu2 %v1366_v21 }
  0x70   :  { %433 = vmatpush.msra.mxu3 %v943_v41  ;;  %371 = vmatpush.msra.mxu0 %v1100_v27 }
  0x71   :  { %392 = vmatpush.msra.mxu1 %v949_v43  ;;  %413 = vmatpush.msra.mxu2 %v1367_v56 }
  0x72   :  { %434 = vmatpush.msra.mxu3 %v953_v44  ;;  %372 = vmatpush.msra.mxu0 %v1111_v45 }
  0x73   :  { %393 = vmatpush.msra.mxu1 %v959_v46  ;;  %414 = vmatpush.msra.mxu2 %v1368_v55 }
  0x74   :  { %435 = vmatpush.msra.mxu3 %v963_v47  ;;  %373 = vmatmul.f32.vlgmr.msra.gmra.mxu0 %v355_v61 }
  0x75   :  { %394 = vmatmul.f32.vlgmr.msra.gmra.mxu1 %v355_v61  ;;  %436 = vmatmul.f32.vlgmr.msra.gmra.mxu3 %v355_v61 }
  0x76   :  { %456 = vmatpush.msrb.mxu0 %v813_v1  ;;  %477 = vmatpush.msrb.mxu1 %v971_v49  ;;  %v442_v1 = vrot.slane %v982_v53, 2 }
  0x77   :  { %498 = vmatpush.msrb.mxu2 %v815_v2  ;;  %519 = vmatpush.msrb.mxu3 %v811_v0  ;;  %v441_v0 = vrot.slane %v965_v48, 3  ;;  %v1369_v2 = vld [vmem:[#allocation12_spill] sm:$0xff] }
  0x78   :  { %415 = vmatmul.f32.vlgmr.msra.gmra.mxu2 %v355_v61  ;;  %457 = vmatpush.msrb.mxu0 %v821_v4  ;;  %v1371_v4 = vld [vmem:[#allocation28_spill] sm:$0xff] }
  0x79   :  { %478 = vmatpush.msrb.mxu1 %v980_v52  ;;  %499 = vmatpush.msrb.mxu2 %v823_v5  ;;  %v444_v5 = vrot.slane %v1358_v15, 1  ;;  %v1377_v15 = vld [vmem:[#allocation16_spill] sm:$0xff] }
  0x7a   :  { %520 = vmatpush.msrb.mxu3 %v819_v3  ;;  %458 = vmatpush.msrb.mxu0 %v829_v7  ;;  %v1370_v3 = vld [vmem:[#allocation14_spill] sm:$0xff]  ;;  %v443_v7 = vsel %vm144_vm0, %v442_v1, %v441_v0 }
  0x7b   :  { %479 = vmatpush.msrb.mxu1 %v988_v54  ;;  %500 = vmatpush.msrb.mxu2 %v833_v8  ;;  %v1373_v8 = vld [vmem:[#allocation30_spill] sm:$0xff] }
  0x7c   :  { %521 = vmatpush.msrb.mxu3 %v827_v6  ;;  %459 = vmatpush.msrb.mxu0 %v839_v10  ;;  %v1372_v6 = vld [vmem:[#allocation13_spill] sm:$0xff]  ;;  %v445_v10 = vsel %vm147_vm1, %v444_v5, %v443_v7 }
  0x7d   :  { %480 = vmatpush.msrb.mxu1 %v999_v58  ;;  %501 = vmatpush.msrb.mxu2 %v843_v11  ;;  %v1375_v11 = vld [vmem:[#allocation15_spill] sm:$0xff] }
  0x7e   :  { %522 = vmatpush.msrb.mxu3 %v837_v9  ;;  %460 = vmatpush.msrb.mxu0 %v849_v13  ;;  %v1374_v9 = vld [vmem:[#allocation31_spill] sm:$0xff]  ;;  %v1376_v13 = vld [vmem:[#allocation32_spill] sm:$0xff] }
  0x7f   :  { %481 = vmatpush.msrb.mxu1 %v1009_v62  ;;  %502 = vmatpush.msrb.mxu2 %v853_v14  ;;  %v447_v14 = vrot.slane %v1360_v42, 7 }
  0x80   :  { %523 = vmatpush.msrb.mxu3 %v1369_v2  ;;  %461 = vmatpush.msrb.mxu0 %v1370_v3 }
  0x81   :  { %482 = vmatpush.msrb.mxu1 %v1371_v4  ;;  %503 = vmatpush.msrb.mxu2 %v863_v17  ;;  %v1378_v17 = vld [vmem:[#allocation26_spill] sm:$0xff] }
  0x82   :  { %524 = vmatpush.msrb.mxu3 %v1372_v6  ;;  %462 = vmatpush.msrb.mxu0 %v869_v19  ;;  %v1379_v19 = vld [vmem:[#allocation33_spill] sm:$0xff] }
  0x83   :  { %483 = vmatpush.msrb.mxu1 %v1373_v8  ;;  %504 = vmatpush.msrb.mxu2 %v873_v20  ;;  %v449_v20 = vrot.slane %v1362_v59, 6 }
  0x84   :  { %525 = vmatpush.msrb.mxu3 %v867_v18  ;;  %463 = vmatpush.msrb.mxu0 %v879_v22  ;;  %v446_v18 = vsel %vm150_vm2, %v1378_v17, %v445_v10 }
  0x85   :  { %484 = vmatpush.msrb.mxu1 %v1374_v9  ;;  %505 = vmatpush.msrb.mxu2 %v883_v23  ;;  %v448_v22 = vsel %vm153_vm3, %v447_v14, %v446_v18  ;;  %v1380_v23 = vld [vmem:[#allocation19_spill] sm:$0xff] }
  0x86   :  { %526 = vmatpush.msrb.mxu3 %v1375_v11  ;;  %464 = vmatpush.msrb.mxu0 %v889_v25  ;;  %v451_v25 = vrot.slane %v1033_v33, 5 }
  0x87   :  { %485 = vmatpush.msrb.mxu1 %v1376_v13  ;;  %506 = vmatpush.msrb.mxu2 %v893_v26  ;;  %v453_v26 = vrot.slane %v1049_v50, 4 }
  0x88   :  { %527 = vmatpush.msrb.mxu3 %v1377_v15  ;;  %465 = vmatpush.msrb.mxu0 %v899_v28 }
  0x89   :  { %486 = vmatpush.msrb.mxu1 %v1379_v19  ;;  %507 = vmatpush.msrb.mxu2 %v903_v29 }
  0x8a   :  { %528 = vmatpush.msrb.mxu3 %v1361_v12  ;;  %466 = vmatpush.msrb.mxu0 %v909_v31  ;;  %v450_v12 = vsel %vm156_vm4, %v449_v20, %v448_v22 }
  0x8b   :  { %487 = vmatpush.msrb.mxu1 %v1067_v30  ;;  %508 = vmatpush.msrb.mxu2 %v1380_v23  ;;  %v452_v28 = vsel %vm159_vm5, %v451_v25, %v450_v12 }
  0x8c   :  { %529 = vmatpush.msrb.mxu3 %v1381_v24  ;;  %467 = vmatpush.msrb.mxu0 %v919_v34  ;;  %v454_v29 = vsel %vm162_vm6, %v453_v26, %v452_v28 }
  0x8d   :  { %488 = vmatpush.msrb.mxu1 %v1075_v63  ;;  %509 = vmatpush.msrb.mxu2 %v923_v35 }
  0x8e   :  { %530 = vmatpush.msrb.mxu3 %v1364_v16  ;;  %468 = vmatpush.msrb.mxu0 %v929_v37 }
  0x8f   :  { %489 = vmatpush.msrb.mxu1 %v1086_v39  ;;  %510 = vmatpush.msrb.mxu2 %v933_v38 }
  0x90   :  { %531 = vmatpush.msrb.mxu3 %v1365_v32  ;;  %469 = vmatpush.msrb.mxu0 %v939_v40 }
  0x91   :  { %490 = vmatpush.msrb.mxu1 %v1093_v57  ;;  %511 = vmatpush.msrb.mxu2 %v943_v41 }
  0x92   :  { %532 = vmatpush.msrb.mxu3 %v1366_v21  ;;  %470 = vmatpush.msrb.mxu0 %v949_v43  ;;  %v1283_v43 = vld [vmem:[#allocation7] sm:$0xf] }
  0x93   :  { %491 = vmatpush.msrb.mxu1 %v1100_v27  ;;  %512 = vmatpush.msrb.mxu2 %v953_v44  ;;  %v541_v52 = vperm.slane %v1283_v43, 0  ;;  %v566_v53 = vperm.slane %v1283_v43, 1  ;;  %v591_v0 = vperm.slane %v1283_v43, 2  ;;  %v616_v14 = vperm.slane %v1283_v43, 3 }
  0x94   :  { %533 = vmatpush.msrb.mxu3 %v1367_v56  ;;  %471 = vmatpush.msrb.mxu0 %v959_v46 }
  0x95   :  { %492 = vmatpush.msrb.mxu1 %v1111_v45  ;;  %513 = vmatpush.msrb.mxu2 %v963_v47 }
  0x96   :  { %534 = vmatpush.msrb.mxu3 %v1368_v55  ;;  %472 = vmatmul.f32.vlgmr.msrb.gmra.mxu0 %v454_v29 }
  0x97   :  { %493 = vmatmul.f32.vlgmr.msrb.gmra.mxu1 %v454_v29  ;;  %514 = vmatmul.f32.vlgmr.msrb.gmra.mxu2 %v454_v29 }
  0x98   :  { %535 = vmatmul.f32.vlgmr.msrb.gmra.mxu3 %v454_v29 }
  0xcb   :  { %v258_v37 = vpop.f32.mrf.mxu3 }
  0xcc   :  { %v182_v31 = vpop.f32.mrf.mxu0 }
  0xce   :  { %v202_v32 = vpop.f32.mrf.mxu1 }
  0xd5   :  { %v237_v33 = vpop.f32.mrf.mxu2  ;;  %v338_v47 = vpop.f32.mrf.mxu3 }
  0xd6   :  { %v278_v35 = vpop.f32.mrf.mxu0  ;;  %v240_v44 = vsub.f32 %v182_v31, %v237_v33  ;;  %v341_v4 = vsub.f32 %v202_v32, %v338_v47 }
  0xd7   :  { %v279_v46 = vadd.f32 %v278_v35, %v258_v37 }
  0xe8   :  { %v298_v34 = vpop.f32.mrf.mxu1 }
  0xf1   :  { %v318_v38 = vpop.f32.mrf.mxu2  ;;  %v374_v40 = vpop.f32.mrf.mxu0 }
  0xf2   :  { %v395_v41 = vpop.f32.mrf.mxu1  ;;  %v377_v48 = vsub.f32 %v240_v44, %v374_v40  ;;  %v319_v57 = vadd.f32 %v318_v38, %v298_v34 }
  0xf3   :  { %v398_v49 = vsub.f32 %v279_v46, %v395_v41 }
  0xf8   :  { %v437_v16 = vpop.f32.mrf.mxu3 }
  0xf9   :  { %v440_v9 = vadd.f32 %v437_v16, %v341_v4 }
  0xfb   :  { %v416_v50 = vpop.f32.mrf.mxu2 }
  0xfc   :  { %v419_v60 = vadd.f32 %v416_v50, %v319_v57 }
 0x113   :  { %v473_v54 = vpop.f32.mrf.mxu0 }
 0x114   :  { %v494_v58 = vpop.f32.mrf.mxu1  ;;  %v476_v62 = vsub.f32 %v377_v48, %v473_v54 }
 0x115   :  { %v497_v30 = vadd.f32 %v494_v58, %v398_v49 }
 0x116   :  { %v542_v63 = vadd.f32 %v541_v52, %v476_v62 }
 0x117   :  { %v567_v39 = vadd.f32 %v566_v53, %v497_v30 }
 0x118   :  { %v544_v27 = vrot.slane %v542_v63, 1  ;;  %v545_v45 = vrot.slane %v542_v63, 2  ;;  %v546_v42 = vrot.slane %v542_v63, 3  ;;  %558 = vst [vmem:[#allocation8] sm:$0x1] %v542_v63  ;;  %v547_v59 = vrot.slane %v542_v63, 4 }
 0x119   :  { %583 = vst [vmem:[#allocation8 + $0x1] sm:$0x1] %v567_v39  ;;  %v548_v36 = vrot.slane %v542_v63, 5  ;;  %v549_v21 = vrot.slane %v542_v63, 6  ;;  %v550_v56 = vrot.slane %v542_v63, 7  ;;  %v569_v61 = vrot.slane %v567_v39, 1 }
 0x11a   :  { %559 = vst [vmem:[#allocation8 + $0x4] sm:$0x1] %v544_v27  ;;  %v515_v51 = vpop.f32.mrf.mxu2  ;;  %v570_v1 = vrot.slane %v567_v39, 2  ;;  %v571_v2 = vrot.slane %v567_v39, 3  ;;  %v572_v3 = vrot.slane %v567_v39, 4  ;;  %v573_v5 = vrot.slane %v567_v39, 5 }
 0x11b   :  { %560 = vst [vmem:[#allocation8 + $0x8] sm:$0x1] %v545_v45  ;;  %v518_v55 = vsub.f32 %v419_v60, %v515_v51  ;;  %v574_v7 = vrot.slane %v567_v39, 6  ;;  %v536_v8 = vpop.f32.mrf.mxu3  ;;  %v575_v10 = vrot.slane %v567_v39, 7 }
 0x11c   :  { %561 = vst [vmem:[#allocation8 + $0xc] sm:$0x1] %v546_v42  ;;  %v539_v13 = vadd.f32 %v536_v8, %v440_v9 }
 0x11d   :  { %562 = vst [vmem:[#allocation8 + $0x10] sm:$0x1] %v547_v59  ;;  %v592_v6 = vadd.f32 %v591_v0, %v518_v55 }
 0x11e   :  { %563 = vst [vmem:[#allocation8 + $0x14] sm:$0x1] %v548_v36  ;;  %v617_v20 = vadd.f32 %v616_v14, %v539_v13 }
 0x11f   :  { %564 = vst [vmem:[#allocation8 + $0x18] sm:$0x1] %v549_v21  ;;  %v594_v11 = vrot.slane %v592_v6, 1  ;;  %v595_v15 = vrot.slane %v592_v6, 2  ;;  %v596_v17 = vrot.slane %v592_v6, 3  ;;  %v597_v18 = vrot.slane %v592_v6, 4 }
 0x120   :  { %565 = vst [vmem:[#allocation8 + $0x1c] sm:$0x1] %v550_v56  ;;  %v598_v19 = vrot.slane %v592_v6, 5  ;;  %v599_v22 = vrot.slane %v592_v6, 6  ;;  %v600_v23 = vrot.slane %v592_v6, 7  ;;  %v619_v24 = vrot.slane %v617_v20, 1 }
 0x121   :  { %584 = vst [vmem:[#allocation8 + $0x5] sm:$0x1] %v569_v61  ;;  %v620_v25 = vrot.slane %v617_v20, 2  ;;  %v621_v12 = vrot.slane %v617_v20, 3  ;;  %v622_v26 = vrot.slane %v617_v20, 4  ;;  %v623_v28 = vrot.slane %v617_v20, 5 }
 0x122   :  { %585 = vst [vmem:[#allocation8 + $0x9] sm:$0x1] %v570_v1  ;;  %v624_v29 = vrot.slane %v617_v20, 6  ;;  %v625_v31 = vrot.slane %v617_v20, 7 }
 0x123   :  { %586 = vst [vmem:[#allocation8 + $0xd] sm:$0x1] %v571_v2 }
 0x124   :  { %587 = vst [vmem:[#allocation8 + $0x11] sm:$0x1] %v572_v3 }
 0x125   :  { %588 = vst [vmem:[#allocation8 + $0x15] sm:$0x1] %v573_v5 }
 0x126   :  { %589 = vst [vmem:[#allocation8 + $0x19] sm:$0x1] %v574_v7 }
 0x127   :  { %590 = vst [vmem:[#allocation8 + $0x1d] sm:$0x1] %v575_v10 }
 0x128   :  { %608 = vst [vmem:[#allocation8 + $0x2] sm:$0x1] %v592_v6 }
 0x129   :  { %609 = vst [vmem:[#allocation8 + $0x6] sm:$0x1] %v594_v11 }
 0x12a   :  { %610 = vst [vmem:[#allocation8 + $0xa] sm:$0x1] %v595_v15 }
 0x12b   :  { %611 = vst [vmem:[#allocation8 + $0xe] sm:$0x1] %v596_v17 }
 0x12c   :  { %612 = vst [vmem:[#allocation8 + $0x12] sm:$0x1] %v597_v18 }
 0x12d   :  { %613 = vst [vmem:[#allocation8 + $0x16] sm:$0x1] %v598_v19 }
 0x12e   :  { %614 = vst [vmem:[#allocation8 + $0x1a] sm:$0x1] %v599_v22 }
 0x12f   :  { %615 = vst [vmem:[#allocation8 + $0x1e] sm:$0x1] %v600_v23 }
 0x130   :  { %633 = vst [vmem:[#allocation8 + $0x3] sm:$0x1] %v617_v20 }
 0x131   :  { %634 = vst [vmem:[#allocation8 + $0x7] sm:$0x1] %v619_v24 }
 0x132   :  { %635 = vst [vmem:[#allocation8 + $0xb] sm:$0x1] %v620_v25 }
 0x133   :  { %636 = vst [vmem:[#allocation8 + $0xf] sm:$0x1] %v621_v12 }
 0x134   :  { %637 = vst [vmem:[#allocation8 + $0x13] sm:$0x1] %v622_v26 }
 0x135   :  { %638 = vst [vmem:[#allocation8 + $0x17] sm:$0x1] %v623_v28 }
 0x136   :  { %639 = vst [vmem:[#allocation8 + $0x1b] sm:$0x1] %v624_v29 }
 0x137   :  { %640 = vst [vmem:[#allocation8 + $0x1f] sm:$0x1] %v625_v31 }
 0x138   :  { %653 = dma.vmem_to_hbm [thread:$0]  %s646_s29, 512, %s648_s5, [#allocation4], %s775_s24, %s775_s24, %s776_s25  }
 0x139   :  { %769 = dma.done.wait [#allocation4], 512  }
 0x13a   :  { %770 = vsyncadd [#allocation4], 4294966784 }
 0x13b   :  { %658 = vsyncpa [#allocation3], 1 }
 0x13c   :  { %659 = vsyncpa [#allocation6], 1 }
 0x13d   :  { %660 = vsyncpa [#allocation4], 1 }

</bundles_post_ra>
